<compile_context>
chip_gen: v6e
topology: v6e:2x2x1
jax: 0.10.0
libtpu: 0.0.40
codegen_flags: <defaults>
</compile_context>

<pallas_src>
import jax
import jax.numpy as jnp
from jax.experimental import pallas as pl
from jax.experimental.pallas import tpu as pltpu


# ----------------------------------------------------------------------------
# Weight quantization (WeightQuantizer.quantize + dequantize), plain JAX glue.
# ----------------------------------------------------------------------------
def quant_dequant(w, num_bits=8):
    if num_bits == 32:
        return w
    qmax = 2 ** (num_bits - 1) - 1
    qmin = -(2 ** (num_bits - 1))
    max_abs = jnp.maximum(jnp.abs(jnp.max(w)), jnp.abs(jnp.min(w)))
    scale = jnp.maximum(max_abs / qmax, 1e-8)
    # torch.round and jnp.round both round half-to-even.
    q = jnp.clip(jnp.round(w / scale), qmin, qmax).astype(jnp.int8)
    return q.astype(jnp.float32) * scale


# ----------------------------------------------------------------------------
# Single fused kernel: conv3x3(+bias, ReLU) -> NCHW-flatten fc1(+ReLU) -> fc2.
# Everything lives in VMEM/vregs; only the final [N, 128] row is written out.
# ----------------------------------------------------------------------------
def fused_forward_kernel(pt_ref, cwt_ref, cb_ref, w1_hbm, b1_ref, w2_ref,
                         b2_ref, o_ref, w1_vmem, w1_sem):
    # pt_ref  : [9*Cin, N*HW]    transposed im2col patches (built in XLA)
    # cwt_ref : [Cout, 9*Cin]    conv weight, cols ordered (kh, kw, cin)
    # cb_ref  : [Cout, 1]
    # w1_hbm  : [HW, Cout*Hid]   fc1 weight (HBM; cols ordered c*Hid + j)
    # b1_ref  : [1, Hid]
    # w2_ref  : [Hid, 128]       fc2 weight, zero-padded to 128 output lanes
    # b2_ref  : [1, 128]
    # o_ref   : [N, 128]
    # w1_vmem : [HW, Cout*Hid]   VMEM landing buffer for the fc1 weight
    # w1_sem  : DMA semaphore
    cout = cwt_ref.shape[0]
    hw = w1_vmem.shape[0]
    hid = b1_ref.shape[1]
    n_batch = o_ref.shape[0]

    # Kick off the fc1-weight fetch (the dominant 256 KB DMA) so it overlaps
    # with the conv matmul below instead of being exposed latency.
    w1_copy = pltpu.make_async_copy(w1_hbm, w1_vmem, w1_sem)
    w1_copy.start()

    # ---- conv3x3 as one transposed im2col matmul + bias + ReLU --------------
    convt = jnp.dot(cwt_ref[...], pt_ref[...],
                    preferred_element_type=jnp.float32)        # [Cout, N*HW]
    convt = jnp.maximum(convt + cb_ref[...], 0.0)

    # ---- regroup per-sample blocks along sublanes ---------------------------
    # [Cout, N*HW] -> [N*Cout, HW]; pure vreg re-indexing (no XLU transpose,
    # no masked stores, no scratch).
    lhs = jnp.concatenate(
        [convt[:, n * hw:(n + 1) * hw] for n in range(n_batch)], axis=0)

    # ---- fc1: NCHW flatten folded into the weight layout --------------------
    # t[n*Cout + c, c'*Hid + j] = sum_hw act[n, c, hw] * W1[j, c'*HW + hw];
    # the PyTorch flatten+Linear is the c == c' diagonal, summed over c with
    # tiny static [1, Hid] slices.
    w1_copy.wait()
    t = jnp.dot(lhs, w1_vmem[...],
                preferred_element_type=jnp.float32)      # [N*Cout, Cout*Hid]
    rows = []
    for n in range(n_batch):
        acc = t[n * cout:n * cout + 1, 0:hid]
        for c in range(1, cout):
            acc = acc + t[n * cout + c:n * cout + c + 1, c * hid:(c + 1) * hid]
        rows.append(acc)
    h = jnp.concatenate(rows, axis=0)                          # [N, Hid]
    h = jnp.maximum(h + b1_ref[...], 0.0)

    # ---- fc2 (padded to 128 lanes -> unmasked lane-dense store) -------------
    o_ref[...] = (jnp.dot(h, w2_ref[...],
                          preferred_element_type=jnp.float32) + b2_ref[...])


def quantized_model_apply(patches_t, conv_wt, conv_b, fc1_w_hwc, fc1_b,
                          fc2_w_pad, fc2_b_pad):
    hw, ch = fc1_w_hwc.shape
    n_batch = patches_t.shape[1] // hw
    o_pad = fc2_w_pad.shape[1]
    return pl.pallas_call(
        fused_forward_kernel,
        out_shape=jax.ShapeDtypeStruct((n_batch, o_pad), jnp.float32),
        in_specs=[
            pl.BlockSpec(memory_space=pltpu.MemorySpace.VMEM),  # patches_t
            pl.BlockSpec(memory_space=pltpu.MemorySpace.VMEM),  # conv weight
            pl.BlockSpec(memory_space=pltpu.MemorySpace.VMEM),  # conv bias
            pl.BlockSpec(memory_space=pl.ANY),                  # fc1 w (manual DMA)
            pl.BlockSpec(memory_space=pltpu.MemorySpace.VMEM),  # fc1 bias
            pl.BlockSpec(memory_space=pltpu.MemorySpace.VMEM),  # fc2 w (padded)
            pl.BlockSpec(memory_space=pltpu.MemorySpace.VMEM),  # fc2 bias (padded)
        ],
        out_specs=pl.BlockSpec(memory_space=pltpu.MemorySpace.VMEM),
        scratch_shapes=[pltpu.VMEM((hw, ch), jnp.float32),
                        pltpu.SemaphoreType.DMA(())],
    )(patches_t, conv_wt, conv_b.reshape(-1, 1), fc1_w_hwc,
      fc1_b.reshape(1, -1), fc2_w_pad, fc2_b_pad.reshape(1, -1))


# ----------------------------------------------------------------------------
# Parameter construction (deterministic) + quantization of conv/linear weights.
# ----------------------------------------------------------------------------
def make_params(num_bits=8):
    key = jax.random.PRNGKey(0)
    k = jax.random.split(key, 6)
    cin, cout, H, W = 4, 8, 16, 16
    hw = H * W
    F = cout * hw               # 2048
    hid, out_dim, o_pad = 32, 10, 128

    # PyTorch-native shapes: conv OIHW, linear [out, in].
    conv_w = jax.random.uniform(k[0], (cout, cin, 3, 3), jnp.float32, -0.3, 0.3)
    conv_b = jax.random.uniform(k[1], (cout,), jnp.float32, -0.1, 0.1)
    fc1_w = jax.random.uniform(k[2], (hid, F), jnp.float32, -0.05, 0.05)
    fc1_b = jax.random.uniform(k[3], (hid,), jnp.float32, -0.05, 0.05)
    fc2_w = jax.random.uniform(k[4], (out_dim, hid), jnp.float32, -0.2, 0.2)
    fc2_b = jax.random.uniform(k[5], (out_dim,), jnp.float32, -0.1, 0.1)

    # QuantizedModel._quantize_model: replace each Conv2d/Linear weight with
    # its dequantized (quantize -> dequantize) version.  Biases untouched.
    conv_w = quant_dequant(conv_w, num_bits)
    fc1_w = quant_dequant(fc1_w, num_bits)
    fc2_w = quant_dequant(fc2_w, num_bits)

    # Kernel-side layouts (all permutations done once at setup time):
    #   conv:  OIHW -> [Cout, 9*Cin], columns ordered (kh, kw, cin)
    #   fc1:   [Hid, c*HW + hw] -> [HW, c*Hid + j]   (flatten folded in)
    #   fc2:   [O, Hid] -> [Hid, 128] zero-padded (lane-dense output store)
    conv_wt_i2c = jnp.transpose(conv_w, (0, 2, 3, 1)).reshape(cout, 9 * cin)
    fc1_w_hwc = (fc1_w.reshape(hid, cout, hw)
                 .transpose(2, 1, 0)
                 .reshape(hw, cout * hid))
    fc2_w_pad = jnp.pad(jnp.transpose(fc2_w, (1, 0)),
                        ((0, 0), (0, o_pad - out_dim)))
    fc2_b_pad = jnp.pad(fc2_b, (0, o_pad - out_dim))

    return {
        # raw (dequantized) PyTorch-layout weights, used by the pure-JAX ref
        "conv_w": conv_w, "conv_b": conv_b,
        "fc1_w": fc1_w, "fc1_b": fc1_b,
        "fc2_w": fc2_w, "fc2_b": fc2_b,
        # kernel-layout weights
        "conv_wt_i2c": conv_wt_i2c,
        "fc1_w_hwc": fc1_w_hwc,
        "fc2_w_pad": fc2_w_pad,
        "fc2_b_pad": fc2_b_pad,
    }


# ----------------------------------------------------------------------------
# Forward pass of the (quantized) model.
# ----------------------------------------------------------------------------
def _im2col_transposed(x_nchw):
    # NCHW -> padded NHWC -> 9 taps concatenated in (kh, kw, cin) order,
    # transposed to [9*Cin, N*H*W].  One tiny fused XLA op on an ~8 KB input.
    n, cin, H, W = x_nchw.shape
    x = jnp.transpose(x_nchw, (0, 2, 3, 1))
    xp = jnp.pad(x, ((0, 0), (1, 1), (1, 1), (0, 0)))
    taps = [xp[:, kh:kh + H, kw:kw + W, :] for kh in range(3) for kw in range(3)]
    patches = jnp.concatenate(taps, axis=-1)          # [N, H, W, 9*Cin]
    return patches.reshape(n * H * W, 9 * cin).T      # [9*Cin, N*H*W]


@jax.jit
def forward(x_nchw, params):
    patches_t = _im2col_transposed(x_nchw)
    out_pad = quantized_model_apply(
        patches_t, params["conv_wt_i2c"], params["conv_b"],
        params["fc1_w_hwc"], params["fc1_b"],
        params["fc2_w_pad"], params["fc2_b_pad"])
    return out_pad[:, :params["fc2_b"].shape[0]]


# Pure-JAX reference (uses the raw PyTorch-layout dequantized weights).
def forward_ref(x_nchw, params):
    y = jax.lax.conv_general_dilated(
        x_nchw, params["conv_w"], window_strides=(1, 1), padding="SAME",
        dimension_numbers=("NCHW", "OIHW", "NCHW"))
    y = jnp.maximum(y + params["conv_b"][None, :, None, None], 0.0)
    flat = y.reshape(y.shape[0], -1)                   # PyTorch NCHW flatten
    h = jnp.maximum(flat @ params["fc1_w"].T + params["fc1_b"], 0.0)
    return h @ params["fc2_w"].T + params["fc2_b"]


if __name__ == "__main__":
    params = make_params(num_bits=8)
    x = jax.random.normal(jax.random.PRNGKey(0), (2, 4, 16, 16), jnp.float32)

    out = forward(x, params)
    jax.block_until_ready(out)

    ref = forward_ref(x, params)
    assert out.shape == (2, 10), out.shape
    assert jnp.allclose(out, ref, rtol=1e-3, atol=1e-3), (
        float(jnp.max(jnp.abs(out - ref))))

    print("KERNEL_OK")
</pallas_src>

<mosaic_0001>
module attributes {stable_mosaic.version = 11 : i64} {
  func.func @fused_forward_kernel(%arg0: memref<36x512xf32, #tpu.memory_space<vmem>>, %arg1: memref<8x36xf32, #tpu.memory_space<vmem>>, %arg2: memref<8x1xf32, #tpu.memory_space<vmem>>, %arg3: memref<256x256xf32, #tpu.memory_space<any>>, %arg4: memref<1x32xf32, #tpu.memory_space<vmem>>, %arg5: memref<32x128xf32, #tpu.memory_space<vmem>>, %arg6: memref<1x128xf32, #tpu.memory_space<vmem>>, %arg7: memref<2x128xf32, #tpu.memory_space<vmem>>, %arg8: memref<256x256xf32, #tpu.memory_space<vmem>>, %arg9: memref<!tpu.dma_semaphore, #tpu.memory_space<semaphore_mem>>) attributes {dimension_semantics = [], scalar_prefetch = 0 : i64, scratch_operands = 2 : i64, tpu.core_type = #tpu.core_type<tc>} {
    tpu.enqueue_dma source(%arg3 : memref<256x256xf32, #tpu.memory_space<any>>) target(%arg8 : memref<256x256xf32, #tpu.memory_space<vmem>>) target_semaphore(%arg9 : memref<!tpu.dma_semaphore, #tpu.memory_space<semaphore_mem>>)
    %c0 = arith.constant 0 : index
    %c0_0 = arith.constant 0 : index
    %0 = vector.load %arg1[%c0, %c0_0] : memref<8x36xf32, #tpu.memory_space<vmem>>, vector<8x36xf32>
    %c0_1 = arith.constant 0 : index
    %c0_2 = arith.constant 0 : index
    %1 = vector.load %arg0[%c0_1, %c0_2] : memref<36x512xf32, #tpu.memory_space<vmem>>, vector<36x512xf32>
    %cst = arith.constant dense<0.000000e+00> : vector<8x512xf32>
    %2 = tpu.matmul %0, %1, %cst {dimension_numbers = #tpu.dot_dimension_numbers<[1], [0], [0], [1], [0, 0, 1, 1], [], []>} : vector<8x36xf32>, vector<36x512xf32>, vector<8x512xf32> -> vector<8x512xf32>
    %c0_3 = arith.constant 0 : index
    %c0_4 = arith.constant 0 : index
    %3 = vector.load %arg2[%c0_3, %c0_4] : memref<8x1xf32, #tpu.memory_space<vmem>>, vector<8x1xf32>
    %4 = vector.broadcast %3 : vector<8x1xf32> to vector<8x512xf32>
    %5 = arith.addf %2, %4 : vector<8x512xf32>
    %cst_5 = arith.constant 0.000000e+00 : f32
    %6 = vector.broadcast %cst_5 : f32 to vector<8x512xf32>
    %7 = arith.maximumf %5, %6 : vector<8x512xf32>
    %8 = vector.extract_strided_slice %7 {offsets = [0, 0], sizes = [8, 256], strides = [1, 1]} : vector<8x512xf32> to vector<8x256xf32>
    %9 = vector.extract_strided_slice %7 {offsets = [0, 256], sizes = [8, 256], strides = [1, 1]} : vector<8x512xf32> to vector<8x256xf32>
    %10 = tpu.concatenate %8, %9 in 0 : vector<8x256xf32>, vector<8x256xf32> -> vector<16x256xf32>
    tpu.wait_dma2 semaphore(%arg9 : memref<!tpu.dma_semaphore, #tpu.memory_space<semaphore_mem>>) src(%arg3 : memref<256x256xf32, #tpu.memory_space<any>>) dst(%arg8 : memref<256x256xf32, #tpu.memory_space<vmem>>)
    %c0_6 = arith.constant 0 : index
    %c0_7 = arith.constant 0 : index
    %11 = vector.load %arg8[%c0_6, %c0_7] : memref<256x256xf32, #tpu.memory_space<vmem>>, vector<256x256xf32>
    %cst_8 = arith.constant dense<0.000000e+00> : vector<16x256xf32>
    %12 = tpu.matmul %10, %11, %cst_8 {dimension_numbers = #tpu.dot_dimension_numbers<[1], [0], [0], [1], [0, 0, 1, 1], [], []>} : vector<16x256xf32>, vector<256x256xf32>, vector<16x256xf32> -> vector<16x256xf32>
    %13 = vector.extract_strided_slice %12 {offsets = [0, 0], sizes = [1, 32], strides = [1, 1]} : vector<16x256xf32> to vector<1x32xf32>
    %14 = vector.extract_strided_slice %12 {offsets = [1, 32], sizes = [1, 32], strides = [1, 1]} : vector<16x256xf32> to vector<1x32xf32>
    %15 = arith.addf %13, %14 : vector<1x32xf32>
    %16 = vector.extract_strided_slice %12 {offsets = [2, 64], sizes = [1, 32], strides = [1, 1]} : vector<16x256xf32> to vector<1x32xf32>
    %17 = arith.addf %15, %16 : vector<1x32xf32>
    %18 = vector.extract_strided_slice %12 {offsets = [3, 96], sizes = [1, 32], strides = [1, 1]} : vector<16x256xf32> to vector<1x32xf32>
    %19 = arith.addf %17, %18 : vector<1x32xf32>
    %20 = vector.extract_strided_slice %12 {offsets = [4, 128], sizes = [1, 32], strides = [1, 1]} : vector<16x256xf32> to vector<1x32xf32>
    %21 = arith.addf %19, %20 : vector<1x32xf32>
    %22 = vector.extract_strided_slice %12 {offsets = [5, 160], sizes = [1, 32], strides = [1, 1]} : vector<16x256xf32> to vector<1x32xf32>
    %23 = arith.addf %21, %22 : vector<1x32xf32>
    %24 = vector.extract_strided_slice %12 {offsets = [6, 192], sizes = [1, 32], strides = [1, 1]} : vector<16x256xf32> to vector<1x32xf32>
    %25 = arith.addf %23, %24 : vector<1x32xf32>
    %26 = vector.extract_strided_slice %12 {offsets = [7, 224], sizes = [1, 32], strides = [1, 1]} : vector<16x256xf32> to vector<1x32xf32>
    %27 = arith.addf %25, %26 : vector<1x32xf32>
    %28 = vector.extract_strided_slice %12 {offsets = [8, 0], sizes = [1, 32], strides = [1, 1]} : vector<16x256xf32> to vector<1x32xf32>
    %29 = vector.extract_strided_slice %12 {offsets = [9, 32], sizes = [1, 32], strides = [1, 1]} : vector<16x256xf32> to vector<1x32xf32>
    %30 = arith.addf %28, %29 : vector<1x32xf32>
    %31 = vector.extract_strided_slice %12 {offsets = [10, 64], sizes = [1, 32], strides = [1, 1]} : vector<16x256xf32> to vector<1x32xf32>
    %32 = arith.addf %30, %31 : vector<1x32xf32>
    %33 = vector.extract_strided_slice %12 {offsets = [11, 96], sizes = [1, 32], strides = [1, 1]} : vector<16x256xf32> to vector<1x32xf32>
    %34 = arith.addf %32, %33 : vector<1x32xf32>
    %35 = vector.extract_strided_slice %12 {offsets = [12, 128], sizes = [1, 32], strides = [1, 1]} : vector<16x256xf32> to vector<1x32xf32>
    %36 = arith.addf %34, %35 : vector<1x32xf32>
    %37 = vector.extract_strided_slice %12 {offsets = [13, 160], sizes = [1, 32], strides = [1, 1]} : vector<16x256xf32> to vector<1x32xf32>
    %38 = arith.addf %36, %37 : vector<1x32xf32>
    %39 = vector.extract_strided_slice %12 {offsets = [14, 192], sizes = [1, 32], strides = [1, 1]} : vector<16x256xf32> to vector<1x32xf32>
    %40 = arith.addf %38, %39 : vector<1x32xf32>
    %41 = vector.extract_strided_slice %12 {offsets = [15, 224], sizes = [1, 32], strides = [1, 1]} : vector<16x256xf32> to vector<1x32xf32>
    %42 = arith.addf %40, %41 : vector<1x32xf32>
    %43 = tpu.concatenate %27, %42 in 0 : vector<1x32xf32>, vector<1x32xf32> -> vector<2x32xf32>
    %c0_9 = arith.constant 0 : index
    %c0_10 = arith.constant 0 : index
    %44 = vector.load %arg4[%c0_9, %c0_10] : memref<1x32xf32, #tpu.memory_space<vmem>>, vector<1x32xf32>
    %45 = vector.broadcast %44 : vector<1x32xf32> to vector<2x32xf32>
    %46 = arith.addf %43, %45 : vector<2x32xf32>
    %cst_11 = arith.constant 0.000000e+00 : f32
    %47 = vector.broadcast %cst_11 : f32 to vector<2x32xf32>
    %48 = arith.maximumf %46, %47 : vector<2x32xf32>
    %c0_12 = arith.constant 0 : index
    %c0_13 = arith.constant 0 : index
    %49 = vector.load %arg5[%c0_12, %c0_13] : memref<32x128xf32, #tpu.memory_space<vmem>>, vector<32x128xf32>
    %cst_14 = arith.constant dense<0.000000e+00> : vector<2x128xf32>
    %50 = tpu.matmul %48, %49, %cst_14 {dimension_numbers = #tpu.dot_dimension_numbers<[1], [0], [0], [1], [0, 0, 1, 1], [], []>} : vector<2x32xf32>, vector<32x128xf32>, vector<2x128xf32> -> vector<2x128xf32>
    %c0_15 = arith.constant 0 : index
    %c0_16 = arith.constant 0 : index
    %51 = vector.load %arg6[%c0_15, %c0_16] : memref<1x128xf32, #tpu.memory_space<vmem>>, vector<1x128xf32>
    %52 = vector.broadcast %51 : vector<1x128xf32> to vector<2x128xf32>
    %53 = arith.addf %50, %52 : vector<2x128xf32>
    %c0_17 = arith.constant 0 : index
    %c0_18 = arith.constant 0 : index
    %54 = vector.load %arg7[%c0_17, %c0_18] : memref<2x128xf32, #tpu.memory_space<vmem>>, vector<2x128xf32>
    tpu.vector_store %arg7[%c0_17, %c0_18], %53 {strides = array<i32>} : memref<2x128xf32, #tpu.memory_space<vmem>>, vector<2x128xf32>,
    return
  }
}

</mosaic_0001>

<bundles_post_ra>
// kernel: forward.1
= control target key start
LH: loop header
LB: loop body
LE: loop exit
PB: predicated region body
PF: predicated region fallthrough
CT: control target
= control target key end

     0   :  { %12 = vsyncpa [#allocation5], 0  ;;  %s1339_s0 = inlined_call_operand.vmem [shape: f32[36,512], index: 0, kind: input, shape index: {}]   ;;  %s1340_s1 = inlined_call_operand.vmem [shape: f32[8,36], index: 1, kind: input, shape index: {}]   ;;  %s1341_s2 = inlined_call_operand.vmem [shape: f32[8,1], index: 2, kind: input, shape index: {}]   ;;  %s1342_s3 = inlined_call_operand.vmem [shape: f32[256,256], index: 3, kind: input, shape index: {}]   ;;  %s1343_s4 = inlined_call_operand.vmem [shape: f32[1,32], index: 4, kind: input, shape index: {}]   ;;  %s1344_s5 = inlined_call_operand.vmem [shape: f32[32,128], index: 5, kind: input, shape index: {}]   ;;  %s1345_s6 = inlined_call_operand.vmem [shape: f32[1,128], index: 6, kind: input, shape index: {}]   ;;  %s1346_s7 = inlined_call_operand.hbm [shape: f32[2,128], index: 7, kind: output, shape index: {}]  }
   0x1   :  { %v835_v0 = vld [vmem:[%s1342_s3] sm:$0xff]  ;;  %v840_v1 = vld [vmem:[%s1342_s3 + $0x8] sm:$0xff]  ;;  %v845_v2 = vld [vmem:[%s1342_s3 + $0x10] sm:$0xff] }
   0x2   :  { %v850_v3 = vld [vmem:[%s1342_s3 + $0x18] sm:$0xff]  ;;  %v855_v4 = vld [vmem:[%s1342_s3 + $0x20] sm:$0xff]  ;;  %v860_v5 = vld [vmem:[%s1342_s3 + $0x28] sm:$0xff] }
   0x3   :  { %v865_v6 = vld [vmem:[%s1342_s3 + $0x30] sm:$0xff]  ;;  %v870_v7 = vld [vmem:[%s1342_s3 + $0x38] sm:$0xff]  ;;  %v875_v8 = vld [vmem:[%s1342_s3 + $0x40] sm:$0xff] }
   0x4   :  { %v880_v9 = vld [vmem:[%s1342_s3 + $0x48] sm:$0xff]  ;;  %v885_v10 = vld [vmem:[%s1342_s3 + $0x50] sm:$0xff]  ;;  %v890_v11 = vld [vmem:[%s1342_s3 + $0x58] sm:$0xff] }
   0x5   :  { %v895_v12 = vld [vmem:[%s1342_s3 + $0x60] sm:$0xff]  ;;  %v900_v13 = vld [vmem:[%s1342_s3 + $0x68] sm:$0xff]  ;;  %v905_v14 = vld [vmem:[%s1342_s3 + $0x70] sm:$0xff] }
   0x6   :  { %v910_v15 = vld [vmem:[%s1342_s3 + $0x78] sm:$0xff]  ;;  %v915_v16 = vld [vmem:[%s1342_s3 + $0x80] sm:$0xff]  ;;  %v920_v17 = vld [vmem:[%s1342_s3 + $0x88] sm:$0xff] }
   0x7   :  { %v925_v18 = vld [vmem:[%s1342_s3 + $0x90] sm:$0xff]  ;;  %v930_v19 = vld [vmem:[%s1342_s3 + $0x98] sm:$0xff]  ;;  %v935_v20 = vld [vmem:[%s1342_s3 + $0xa0] sm:$0xff] }
   0x8   :  { %v940_v21 = vld [vmem:[%s1342_s3 + $0xa8] sm:$0xff]  ;;  %v945_v22 = vld [vmem:[%s1342_s3 + $0xb0] sm:$0xff]  ;;  %v950_v23 = vld [vmem:[%s1342_s3 + $0xb8] sm:$0xff] }
   0x9   :  { %v955_v24 = vld [vmem:[%s1342_s3 + $0xc0] sm:$0xff]  ;;  %v960_v25 = vld [vmem:[%s1342_s3 + $0xc8] sm:$0xff]  ;;  %v965_v26 = vld [vmem:[%s1342_s3 + $0xd0] sm:$0xff] }
   0xa   :  { %v970_v27 = vld [vmem:[%s1342_s3 + $0xd8] sm:$0xff]  ;;  %v975_v28 = vld [vmem:[%s1342_s3 + $0xe0] sm:$0xff]  ;;  %v980_v29 = vld [vmem:[%s1342_s3 + $0xe8] sm:$0xff] }
   0xb   :  { %v985_v30 = vld [vmem:[%s1342_s3 + $0xf0] sm:$0xff]  ;;  %v990_v31 = vld [vmem:[%s1342_s3 + $0xf8] sm:$0xff]  ;;  %v995_v32 = vld [vmem:[%s1342_s3 + $0x100] sm:$0xff] }
   0xc   :  { %1349 = vst [vmem:[#allocation9_spill] sm:$0xff] %v995_v32  ;;  %v1000_v33 = vld [vmem:[%s1342_s3 + $0x108] sm:$0xff]  ;;  %v1005_v34 = vld [vmem:[%s1342_s3 + $0x110] sm:$0xff]  ;;  %v1010_v35 = vld [vmem:[%s1342_s3 + $0x118] sm:$0xff] }
   0xd   :  { %1350 = vst [vmem:[#allocation10_spill] sm:$0xff] %v1000_v33  ;;  %1351 = vst [vmem:[#allocation11_spill] sm:$0xff] %v1005_v34  ;;  %v1015_v36 = vld [vmem:[%s1342_s3 + $0x120] sm:$0xff]  ;;  %v1020_v37 = vld [vmem:[%s1342_s3 + $0x128] sm:$0xff] }
   0xe   :  { %1352 = vst [vmem:[#allocation12_spill] sm:$0xff] %v1010_v35  ;;  %1353 = vst [vmem:[#allocation13_spill] sm:$0xff] %v1015_v36  ;;  %v1025_v38 = vld [vmem:[%s1342_s3 + $0x130] sm:$0xff]  ;;  %v1030_v39 = vld [vmem:[%s1342_s3 + $0x138] sm:$0xff] }
   0xf   :  { %1354 = vst [vmem:[#allocation14_spill] sm:$0xff] %v1020_v37  ;;  %1355 = vst [vmem:[#allocation15_spill] sm:$0xff] %v1025_v38  ;;  %v1035_v40 = vld [vmem:[%s1342_s3 + $0x140] sm:$0xff]  ;;  %v1040_v41 = vld [vmem:[%s1342_s3 + $0x148] sm:$0xff] }
  0x10   :  { %1356 = vst [vmem:[#allocation16_spill] sm:$0xff] %v1030_v39  ;;  %1357 = vst [vmem:[#allocation17_spill] sm:$0xff] %v1035_v40  ;;  %v1045_v42 = vld [vmem:[%s1342_s3 + $0x150] sm:$0xff]  ;;  %v1050_v43 = vld [vmem:[%s1342_s3 + $0x158] sm:$0xff] }
  0x11   :  { %1358 = vst [vmem:[#allocation18_spill] sm:$0xff] %v1040_v41  ;;  %1359 = vst [vmem:[#allocation19_spill] sm:$0xff] %v1045_v42  ;;  %v1055_v44 = vld [vmem:[%s1342_s3 + $0x160] sm:$0xff]  ;;  %v1060_v45 = vld [vmem:[%s1342_s3 + $0x168] sm:$0xff] }
  0x12   :  { %1360 = vst [vmem:[#allocation20_spill] sm:$0xff] %v1050_v43  ;;  %1361 = vst [vmem:[#allocation21_spill] sm:$0xff] %v1055_v44  ;;  %v1065_v46 = vld [vmem:[%s1342_s3 + $0x170] sm:$0xff]  ;;  %v1070_v47 = vld [vmem:[%s1342_s3 + $0x178] sm:$0xff] }
  0x13   :  { %1362 = vst [vmem:[#allocation22_spill] sm:$0xff] %v1060_v45  ;;  %1363 = vst [vmem:[#allocation23_spill] sm:$0xff] %v1065_v46  ;;  %v1075_v48 = vld [vmem:[%s1342_s3 + $0x180] sm:$0xff]  ;;  %v1080_v49 = vld [vmem:[%s1342_s3 + $0x188] sm:$0xff] }
  0x14   :  { %1364 = vst [vmem:[#allocation24_spill] sm:$0xff] %v1070_v47  ;;  %v1085_v50 = vld [vmem:[%s1342_s3 + $0x190] sm:$0xff]  ;;  %v1090_v51 = vld [vmem:[%s1342_s3 + $0x198] sm:$0xff]  ;;  %v1095_v52 = vld [vmem:[%s1342_s3 + $0x1a0] sm:$0xff] }
  0x15   :  { %v1100_v53 = vld [vmem:[%s1342_s3 + $0x1a8] sm:$0xff]  ;;  %v1105_v54 = vld [vmem:[%s1342_s3 + $0x1b0] sm:$0xff]  ;;  %v1110_v55 = vld [vmem:[%s1342_s3 + $0x1b8] sm:$0xff] }
  0x16   :  { %v1115_v56 = vld [vmem:[%s1342_s3 + $0x1c0] sm:$0xff]  ;;  %v1120_v57 = vld [vmem:[%s1342_s3 + $0x1c8] sm:$0xff]  ;;  %v1125_v58 = vld [vmem:[%s1342_s3 + $0x1d0] sm:$0xff] }
  0x17   :  { %v1130_v59 = vld [vmem:[%s1342_s3 + $0x1d8] sm:$0xff]  ;;  %v1135_v60 = vld [vmem:[%s1342_s3 + $0x1e0] sm:$0xff]  ;;  %v1140_v61 = vld [vmem:[%s1342_s3 + $0x1e8] sm:$0xff] }
  0x18   :  { %v1145_v62 = vld [vmem:[%s1342_s3 + $0x1f0] sm:$0xff]  ;;  %v1150_v63 = vld [vmem:[%s1342_s3 + $0x1f8] sm:$0xff] }
  0x19   :  { %193 = vsyncadd [#allocation3], 8192  ;;  %v212_v32 = vld [vmem:[%s1339_s0 + $0x88] sm:$0xf]  ;;  %vm225_vm0 = vcmask 1043456   ;;  %v207_v35 = vld [vmem:[%s1339_s0 + $0x60] sm:$0xff]  ;;  %452 = vmatprep.subr.mxu0 %v990_v31 }
  0x1a   :  { %v208_v33 = vld [vmem:[%s1339_s0 + $0x68] sm:$0xff]  ;;  %727 = vmatprep.subr.msk.mxu1 %vm225_vm0, %v212_v32  ;;  %v211_v34 = vld [vmem:[%s1339_s0 + $0x80] sm:$0xf]  ;;  %v1347_v37 = vmov 0.0   ;;  %v786_v38 = vmov 0   ;;  %vm221_vm1 = vcmask 293888  }
  0x1b   :  { %728 = vmatpush1.msk.msra.mxu1 %vm225_vm0, %v211_v34  ;;  %v204_v36 = vld [vmem:[%s1339_s0 + $0x48] sm:$0xff]  ;;  %302 = vmatprep.mubr.f32.mxu1 %v1347_v37  ;;  %v203_v32 = vld [vmem:[%s1339_s0 + $0x40] sm:$0xff]  ;;  %v209_v37 = vld [vmem:[%s1339_s0 + $0x70] sm:$0xff] }
  0x1c   :  { %262 = vmatprep.subr.mxu1 %v208_v33  ;;  %760 = vset.pattern.permute.xlu0 %v786_v38  ;;  %v200_v39 = vld [vmem:[%s1339_s0 + $0x28] sm:$0xff]  ;;  %v199_v34 = vld [vmem:[%s1339_s0 + $0x20] sm:$0xff]  ;;  %v198_v40 = vld [vmem:[%s1339_s0 + $0x18] sm:$0xff] }
  0x1d   :  { %263 = vmatpush1.msra.mxu1 %v207_v35  ;;  %v196_v33 = vld [vmem:[%s1339_s0 + $0x8] sm:$0xff]  ;;  %v195_v38 = vld [vmem:[%s1339_s0] sm:$0xff] }
  0x1e   :  { %264 = vmatprep.subr.mxu1 %v204_v36  ;;  %v215_v35 = vld [vmem:[%s1341_s2] sm:$0xff] }
  0x1f   :  { %265 = vmatpush1.msra.mxu1 %v203_v32  ;;  %v194_v36 = vld [vmem:[%s1340_s1] sm:$0xff]  ;;  %v214_v32 = vld [vmem:[%s1339_s0 + $0x98] sm:$0xf]  ;;  %218 = vperm.xlu0 %760, %v215_v35   ;;  %v1365_v35 = vmov 0.0  }
  0x20   :  { %266 = vmatprep.subr.mxu1 %v200_v39  ;;  %v213_v39 = vld [vmem:[%s1339_s0 + $0x90] sm:$0xf] }
  0x21   :  { %267 = vmatpush1.msra.mxu1 %v199_v34  ;;  %v210_v34 = vld [vmem:[%s1339_s0 + $0x78] sm:$0xff] }
  0x22   :  { %268 = vmatprep.subr.mxu1 %v196_v33  ;;  %v206_v33 = vld [vmem:[%s1339_s0 + $0x58] sm:$0xff] }
  0x23   :  { %269 = vmatpush1.msra.mxu1 %v195_v38  ;;  %v205_v38 = vld [vmem:[%s1339_s0 + $0x50] sm:$0xff] }
  0x24   :  { %729 = vmatmul.mubr.msk.f32.vlgmr.msra.gmra.mxu1 %vm221_vm1, %v194_v36  ;;  %730 = vmatprep.subr.msk.mxu1 %vm225_vm0, %v214_v32  ;;  %v202_v32 = vld [vmem:[%s1339_s0 + $0x38] sm:$0xff] }
  0x25   :  { %731 = vmatpush1.msk.msra.mxu1 %vm225_vm0, %v213_v39  ;;  %373 = vmatprep.mubr.f32.mxu1 %v1365_v35  ;;  %v201_v39 = vld [vmem:[%s1339_s0 + $0x30] sm:$0xff] }
  0x26   :  { %333 = vmatprep.subr.mxu1 %v210_v34  ;;  %v197_v34 = vld [vmem:[%s1339_s0 + $0x10] sm:$0xff] }
  0x27   :  { %334 = vmatpush1.msra.mxu1 %v209_v37 }
  0x28   :  { %335 = vmatprep.subr.mxu1 %v206_v33 }
  0x29   :  { %336 = vmatpush1.msra.mxu1 %v205_v38 }
  0x2a   :  { %337 = vmatprep.subr.mxu1 %v202_v32 }
  0x2b   :  { %338 = vmatpush1.msra.mxu1 %v201_v39 }
  0x2c   :  { %339 = vmatprep.subr.mxu1 %v198_v40 }
  0x2d   :  { %340 = vmatpush1.msra.mxu1 %v197_v34 }
  0x2e   :  { %732 = vmatmul.mubr.msk.f32.vlgmr.msra.gmra.mxu1 %vm221_vm1, %v194_v36 }
  0x9a   :  { %v219_v37 = vpop.permute.xlu0 %218 }
  0xe4   :  { %v304_v33 = vpop.f32.mrf.mxu1 }
  0xe5   :  { %v1226_v41 = vadd.f32 %v304_v33, %v219_v37 }
  0xe6   :  { %v306_v42 = vpop.f32.mrf.mxu1 }
  0xe7   :  { %v380_v38 = vmax.f32 %v1226_v41, 0.0  ;;  %v307_v43 = vadd.f32 %v306_v42, %v219_v37 }
  0xe9   :  { %v381_v44 = vmax.f32 %v307_v43, 0.0 }
  0xeb   :  { %516 = vmatprep.mubr.f32.mxu0 %v381_v44 }
  0xee   :  { %v375_v45 = vpop.f32.mrf.mxu1 }
  0xef   :  { %v1229_v32 = vadd.f32 %v375_v45, %v219_v37 }
  0xf0   :  { %v377_v46 = vpop.f32.mrf.mxu1 }
  0xf1   :  { %v382_v47 = vmax.f32 %v1229_v32, 0.0  ;;  %v1232_v39 = vadd.f32 %v377_v46, %v219_v37 }
  0xf3   :  { %v383_v40 = vmax.f32 %v1232_v39, 0.0 }
  0xf4   :  { %781 = dma.done.wait [#allocation3], 8192 }
  0xf5   :  { %782 = vsyncadd [#allocation3], 4294959104  ;;  %453 = vmatpush1.msra.mxu0 %v985_v30  ;;  %742 = vmatprep.subr.mxu1 %v1365_v35  ;;  %s787_s0 = smov 64   ;;  %s788_s8 = smov 96   ;;  %v614_v30 = vld [vmem:[%s1344_s5 + $0x8] sm:$0xff]  ;;  %v613_v42 = vld [vmem:[%s1344_s5] sm:$0xff] }
  0xf6   :  { %454 = vmatprep.subr.mxu0 %v980_v29  ;;  %s789_s9 = smov 32   ;;  %v615_v29 = vld [vmem:[%s1344_s5 + $0x10] sm:$0xff]  ;;  %vm790_vm2 = vmmov 0   ;;  %vm602_vm3 = vcmask 1040384   ;;  %vm624_vm4 = vcmask 261120   ;;  %s791_s2 = smov [#allocation4]  }
  0xf7   :  { %455 = vmatpush1.msra.mxu0 %v975_v28  ;;  %750 = vmatprep.mubr.msk.f32.mxu1 %vm790_vm2, %v1365_v35  ;;  %s705_s20 = sshll.u32 %s791_s2, 4  ;;  %s706_s20 = int_to_ptr.vmem [resolvable:$true] %s705_s20 }
  0xf8   :  { %456 = vmatprep.subr.mxu0 %v970_v27  ;;  %s761_s21 = scalar_lea.vmem %s706_s20, 32  ;;  %p766_p1 = scmp.lt.s32.totalorder %s706_s20, %s706_s20 }
  0xf9   :  { %457 = vmatpush1.msra.mxu0 %v965_v26  ;;  %v616_v26 = vld [vmem:[%s1344_s5 + $0x18] sm:$0xff]  ;;  %p762_p0 = scmp.ne.s32.totalorder %s706_s20, %s761_s21  ;;  %p767_p2 = scmp.lt.s32.totalorder %s761_s21, %s761_s21 }
  0xfa   :  { %458 = vmatprep.subr.mxu0 %v960_v25  ;;  %743 = vmatpush3.msra.mxu1 %v616_v26 }
  0xfb   :  { %459 = vmatpush1.msra.mxu0 %v955_v24  ;;  %744 = vmatprep.subr.mxu1 %v1365_v35  ;;  %p768_p3 = por %p767_p2, %p766_p1 }
  0xfc   :  { %460 = vmatprep.subr.mxu0 %v950_v23  ;;  %745 = vmatpush3.msra.mxu1 %v615_v29 }
  0xfd   :  { %461 = vmatpush1.msra.mxu0 %v945_v22  ;;  %746 = vmatprep.subr.mxu1 %v1365_v35  ;;  %p769_p4 = pnand %p768_p3, %p762_p0 }
  0xfe   :  { %462 = vmatprep.subr.mxu0 %v940_v21  ;;  %747 = vmatpush3.msra.mxu1 %v614_v30 }
  0xff   :  { %463 = vmatpush1.msra.mxu0 %v935_v20  ;;  %748 = vmatprep.subr.mxu1 %v1365_v35 }
 0x100   :  { %464 = vmatprep.subr.mxu0 %v930_v19  ;;  %749 = vmatpush3.msra.mxu1 %v613_v42 }
 0x101   :  { %465 = vmatpush1.msra.mxu0 %v925_v18 }
 0x102   :  { %466 = vmatprep.subr.mxu0 %v920_v17 }
 0x103   :  { %467 = vmatpush1.msra.mxu0 %v915_v16 }
 0x104   :  { %468 = vmatprep.subr.mxu0 %v910_v15  ;;  %v1381_v15 = vld [vmem:[#allocation9_spill] sm:$0xff] }
 0x105   :  { %469 = vmatpush1.msra.mxu0 %v905_v14  ;;  %v1380_v14 = vld [vmem:[#allocation10_spill] sm:$0xff] }
 0x106   :  { %470 = vmatprep.subr.mxu0 %v900_v13  ;;  %v1379_v13 = vld [vmem:[#allocation11_spill] sm:$0xff] }
 0x107   :  { %471 = vmatpush1.msra.mxu0 %v895_v12  ;;  %v1378_v12 = vld [vmem:[#allocation12_spill] sm:$0xff] }
 0x108   :  { %472 = vmatprep.subr.mxu0 %v890_v11  ;;  %v1377_v11 = vld [vmem:[#allocation13_spill] sm:$0xff] }
 0x109   :  { %473 = vmatpush1.msra.mxu0 %v885_v10  ;;  %v1376_v10 = vld [vmem:[#allocation14_spill] sm:$0xff] }
 0x10a   :  { %474 = vmatprep.subr.mxu0 %v880_v9  ;;  %v1375_v9 = vld [vmem:[#allocation15_spill] sm:$0xff] }
 0x10b   :  { %475 = vmatpush1.msra.mxu0 %v875_v8  ;;  %v1374_v8 = vld [vmem:[#allocation16_spill] sm:$0xff] }
 0x10c   :  { %476 = vmatprep.subr.mxu0 %v870_v7  ;;  %v1373_v7 = vld [vmem:[#allocation17_spill] sm:$0xff] }
 0x10d   :  { %477 = vmatpush1.msra.mxu0 %v865_v6  ;;  %v1372_v6 = vld [vmem:[#allocation18_spill] sm:$0xff] }
 0x10e   :  { %478 = vmatprep.subr.mxu0 %v860_v5  ;;  %v1371_v5 = vld [vmem:[#allocation19_spill] sm:$0xff] }
 0x10f   :  { %479 = vmatpush1.msra.mxu0 %v855_v4  ;;  %v1370_v4 = vld [vmem:[#allocation20_spill] sm:$0xff] }
 0x110   :  { %480 = vmatprep.subr.mxu0 %v850_v3  ;;  %v1369_v3 = vld [vmem:[#allocation21_spill] sm:$0xff] }
 0x111   :  { %481 = vmatpush1.msra.mxu0 %v845_v2  ;;  %v1368_v2 = vld [vmem:[#allocation22_spill] sm:$0xff] }
 0x112   :  { %482 = vmatprep.subr.mxu0 %v840_v1  ;;  %v1367_v1 = vld [vmem:[#allocation23_spill] sm:$0xff] }
 0x113   :  { %483 = vmatpush1.msra.mxu0 %v835_v0  ;;  %v1366_v0 = vld [vmem:[#allocation24_spill] sm:$0xff] }
 0x114   :  { %484 = vmatprep.subr.mxu0 %v1150_v63 }
 0x115   :  { %485 = vmatpush2.msra.mxu0 %v1145_v62 }
 0x116   :  { %486 = vmatprep.subr.mxu0 %v1140_v61 }
 0x117   :  { %487 = vmatpush2.msra.mxu0 %v1135_v60 }
 0x118   :  { %488 = vmatprep.subr.mxu0 %v1130_v59 }
 0x119   :  { %489 = vmatpush2.msra.mxu0 %v1125_v58 }
 0x11a   :  { %490 = vmatprep.subr.mxu0 %v1120_v57 }
 0x11b   :  { %491 = vmatpush2.msra.mxu0 %v1115_v56 }
 0x11c   :  { %492 = vmatprep.subr.mxu0 %v1110_v55 }
 0x11d   :  { %493 = vmatpush2.msra.mxu0 %v1105_v54 }
 0x11e   :  { %494 = vmatprep.subr.mxu0 %v1100_v53 }
 0x11f   :  { %495 = vmatpush2.msra.mxu0 %v1095_v52 }
 0x120   :  { %496 = vmatprep.subr.mxu0 %v1090_v51 }
 0x121   :  { %497 = vmatpush2.msra.mxu0 %v1085_v50 }
 0x122   :  { %498 = vmatprep.subr.mxu0 %v1080_v49 }
 0x123   :  { %499 = vmatpush2.msra.mxu0 %v1075_v48 }
 0x124   :  { %500 = vmatprep.subr.mxu0 %v1366_v0 }
 0x125   :  { %501 = vmatpush2.msra.mxu0 %v1367_v1  ;;  %v733_v1 = vld [vmem:[%s1343_s4] ss:$0 sm:$0xff] }
 0x126   :  { %502 = vmatprep.subr.mxu0 %v1368_v2 }
 0x127   :  { %503 = vmatpush2.msra.mxu0 %v1369_v3 }
 0x128   :  { %504 = vmatprep.subr.mxu0 %v1370_v4 }
 0x129   :  { %505 = vmatpush2.msra.mxu0 %v1371_v5  ;;  %v734_v5 = vld [vmem:[%s1345_s6] ss:$0 sm:$0xff] }
 0x12a   :  { %506 = vmatprep.subr.mxu0 %v1372_v6 }
 0x12b   :  { %507 = vmatpush2.msra.mxu0 %v1373_v7 }
 0x12c   :  { %508 = vmatprep.subr.mxu0 %v1374_v8 }
 0x12d   :  { %509 = vmatpush2.msra.mxu0 %v1375_v9 }
 0x12e   :  { %510 = vmatprep.subr.mxu0 %v1376_v10 }
 0x12f   :  { %511 = vmatpush2.msra.mxu0 %v1377_v11 }
 0x130   :  { %512 = vmatprep.subr.mxu0 %v1378_v12 }
 0x131   :  { %513 = vmatpush2.msra.mxu0 %v1379_v13 }
 0x132   :  { %514 = vmatprep.subr.mxu0 %v1380_v14 }
 0x133   :  { %515 = vmatpush2.msra.mxu0 %v1381_v15 }
 0x134   :  { %517 = vmatmul.mubr.f32.vlgmr.msra.gmra.mxu0 %v380_v38 }
 0x135   :  { %522 = vmatprep.mubr.f32.mxu0 %v383_v40 }
 0x138   :  { %523 = vmatmul.mubr.f32.gmra.mxu0 %v382_v47 }
 0x1f4   :  { %v518_v16 = vpop.f32.mrf.mxu0 }
 0x1f5   :  { %v535_v17 = vrot.slane %v518_v16, 2  ;;  %v530_v18 = vrot.slane %v518_v16, 1  ;;  %v540_v21 = vrot.slane %v518_v16, 3 }
 0x1f6   :  { %v520_v19 = vpop.f32.mrf.mxu0 }
 0x1f7   :  { %536 = vrot.lane.b32.xlu1 %v535_v17, %s787_s0  ;;  %531 = vrot.lane.b32.xlu0 %v530_v18, %s788_s8  ;;  %v549_v28 = vrot.slane %v520_v19, 5  ;;  %v554_v41 = vrot.slane %v520_v19, 6  ;;  %v559_v44 = vrot.slane %v520_v19, 7  ;;  %v546_v61 = vrot.slane %v520_v19, 4 }
 0x1f8   :  { %v524_v20 = vpop.f32.mrf.mxu0 }
 0x1f9   :  { %v565_v22 = vrot.slane %v524_v20, 1  ;;  %v570_v23 = vrot.slane %v524_v20, 2  ;;  %v575_v24 = vrot.slane %v524_v20, 3 }
 0x1fa   :  { %v526_v25 = vpop.f32.mrf.mxu0 }
 0x1fb   :  { %541 = vrot.lane.b32.xlu1 %v540_v21, %s789_s9  ;;  %566 = vrot.lane.b32.xlu0 %v565_v22, %s788_s8  ;;  %v584_v27 = vrot.slane %v526_v25, 5  ;;  %v589_v31 = vrot.slane %v526_v25, 6  ;;  %v594_v43 = vrot.slane %v526_v25, 7  ;;  %v581_v55 = vrot.slane %v526_v25, 4 }
 0x1ff   :  { %571 = vrot.lane.b32.xlu1 %v570_v23, %s787_s0  ;;  %576 = vrot.lane.b32.xlu0 %v575_v24, %s789_s9 }
 0x203   :  { %550 = vrot.lane.b32.xlu1 %v549_v28, %s788_s8  ;;  %585 = vrot.lane.b32.xlu0 %v584_v27, %s788_s8 }
 0x207   :  { %555 = vrot.lane.b32.xlu1 %v554_v41, %s787_s0  ;;  %590 = vrot.lane.b32.xlu0 %v589_v31, %s787_s0 }
 0x20b   :  { %560 = vrot.lane.b32.xlu1 %v559_v44, %s789_s9  ;;  %595 = vrot.lane.b32.xlu0 %v594_v43, %s789_s9 }
 0x269   :  { %v537_v45 = vpop.permute.xlu1 %536  ;;  %v532_v46 = vpop.permute.xlu0 %531 }
 0x26a   :  { %v534_v49 = vadd.f32 %v532_v46, %v518_v16 }
 0x26c   :  { %v539_v53 = vadd.f32 %v537_v45, %v534_v49 }
 0x26d   :  { %v542_v47 = vpop.permute.xlu1 %541  ;;  %v567_v48 = vpop.permute.xlu0 %566 }
 0x26e   :  { %v569_v50 = vadd.f32 %v567_v48, %v524_v20  ;;  %v544_v59 = vadd.f32 %v542_v47, %v539_v53 }
 0x270   :  { %v548_v35 = vadd.f32 %v546_v61, %v544_v59 }
 0x271   :  { %v572_v51 = vpop.permute.xlu1 %571  ;;  %v577_v52 = vpop.permute.xlu0 %576 }
 0x272   :  { %v574_v54 = vadd.f32 %v572_v51, %v569_v50 }
 0x274   :  { %v579_v56 = vadd.f32 %v577_v52, %v574_v54 }
 0x275   :  { %v551_v57 = vpop.permute.xlu1 %550  ;;  %v586_v58 = vpop.permute.xlu0 %585 }
 0x276   :  { %v583_v60 = vadd.f32 %v581_v55, %v579_v56  ;;  %v553_v34 = vadd.f32 %v551_v57, %v548_v35 }
 0x278   :  { %v588_v62 = vadd.f32 %v586_v58, %v583_v60 }
 0x279   :  { %v556_v63 = vpop.permute.xlu1 %555  ;;  %v591_v36 = vpop.permute.xlu0 %590 }
 0x27a   :  { %v593_v37 = vadd.f32 %v591_v36, %v588_v62  ;;  %v558_v32 = vadd.f32 %v556_v63, %v553_v34 }
 0x27d   :  { %v561_v33 = vpop.permute.xlu1 %560  ;;  %v596_v38 = vpop.permute.xlu0 %595 }
 0x27e   :  { %v598_v39 = vadd.f32 %v596_v38, %v593_v37  ;;  %v563_v40 = vadd.f32 %v561_v33, %v558_v32 }
 0x280   :  { %v600_v0 = vrot.slane %v598_v39, 7 }
 0x282   :  { %v603_v2 = vsel %vm602_vm3, %v563_v40, %v600_v0 }
 0x283   :  { %v611_v3 = vadd.f32 %v733_v1, %v603_v2 }
 0x285   :  { %v612_v4 = vmax.f32 %v611_v3, 0.0 }
 0x287   :  { %751 = vmatmul.mubr.msk.f32.vlgmr.msra.gmra.mxu1 %vm624_vm4, %v612_v4 }
 0x347   :  { %v694_v6 = vpop.f32.mrf.mxu1 }
 0x348   :  { %v695_v7 = vadd.f32 %v734_v5, %v694_v6 }
 0x349   :  { %v752_v8 = vpop.f32.mrf.mxu1 }
 0x34a   :  { %698 = vst [vmem:[#allocation4] sm:$0x3] %v695_v7 }
 0x34b   :  { %772 = shalt.err (!%p769_p4)
}
 0x34c   :  { %708 = dma.vmem_to_hbm [thread:$0]  %s706_s20, 32, %s1346_s7, [#allocation5]  }
 0x34d   :  { %783 = dma.done.wait [#allocation5], 32  }
 0x34e   :  { %784 = vsyncadd [#allocation5], 4294967264 }
 0x34f   :  { %712 = vsyncpa [#allocation5], 1 }
 0x350   :  { %713 = vsyncmov [#allocation3] }
 0x353   :  { %s714_s6 = vpop.sfrf %713 }
 0x354   :  { %p736_p5 = scmp.ne.s32.totalorder %s714_s6, 0 }
 0x356   :  { %718 = shalt.err (%p736_p5)  }

</bundles_post_ra>
